<compile_context>
chip_gen: v5e
topology: v5e:2x2
jax: 0.10.0
libtpu: 0.0.40
codegen_flags: <defaults>
</compile_context>

<pallas_src>
from functools import partial

import jax
import jax.numpy as jnp
from jax.experimental import pallas as pl
from jax.experimental.pallas import tpu as pltpu


def _residual_block_kernel(x_ref, w1_ref, w2_ref, o_ref, pk1, pk2, *,
                           bt, h, wcin, wcout, has_proj):
    """One grid step: bt whole images, row-flattened and lane-padded.

    x_ref : (bt, h, wcin)              f32 input tile   (wcin  = padded W*Cin)
    w1_ref: (3*wcin, wcout)            bf16 conv1 banded weights, kh blocks on K
    w2_ref: (3*wcout [+ wcin], wcout)  bf16 conv2 banded weights [+ 1x1 shortcut]
    o_ref : (bt, h, wcout)             f32 output tile  (wcout = padded W*Cout)
    pk1   : (bt, h, 3*wcin)            VMEM scratch, K-packed conv1 operand
    pk2   : (bt, h, 3*wcout [+ wcin])  VMEM scratch, K-packed conv2 operand
    """
    rows = bt * h
    k1 = 3 * wcin
    k2 = 3 * wcout + (wcin if has_proj else 0)
    zin = jnp.zeros((bt, 1, wcin), jnp.float32)
    zout = jnp.zeros((bt, 1, wcout), jnp.float32)

    # ---- conv1 operand: lanes [0:wcin] = row r-1, [wcin:2wcin] = row r,
    # [2wcin:3wcin] = row r+1.  All packing is per-image ref slicing; the
    # H zero-padding is fused here (rows 0 / h-1 of the shifted blocks).
    pk1[:, :, wcin:2 * wcin] = x_ref[...]
    pk1[:, 1:h, 0:wcin] = x_ref[:, 0:h - 1, :]
    pk1[:, 0:1, 0:wcin] = zin
    pk1[:, 0:h - 1, 2 * wcin:3 * wcin] = x_ref[:, 1:h, :]
    pk1[:, h - 1:h, 2 * wcin:3 * wcin] = zin

    # ---- conv1 (3x3, pad 1): single MXU dot, bf16 operands, f32 accumulate.
    p1 = pk1[...].reshape(rows, k1).astype(jnp.bfloat16)
    h1 = jnp.maximum(
        jnp.dot(p1, w1_ref[...], preferred_element_type=jnp.float32), 0.0)

    # ---- conv2 operand, packed the same way from h1 (shifted blocks are
    # re-sliced out of the scratch's own centre block to stay on the ref path).
    pk2[:, :, wcout:2 * wcout] = h1.reshape(bt, h, wcout)
    pk2[:, 1:h, 0:wcout] = pk2[:, 0:h - 1, wcout:2 * wcout]
    pk2[:, 0:1, 0:wcout] = zout
    pk2[:, 0:h - 1, 2 * wcout:3 * wcout] = pk2[:, 1:h, wcout:2 * wcout]
    pk2[:, h - 1:h, 2 * wcout:3 * wcout] = zout
    if has_proj:
        # 1x1 projection shortcut fused into conv2's K dimension.
        pk2[:, :, 3 * wcout:3 * wcout + wcin] = x_ref[...]

    # ---- conv2 (+ fused shortcut): single MXU dot.
    p2 = pk2[...].reshape(rows, k2).astype(jnp.bfloat16)
    out = jnp.dot(p2, w2_ref[...], preferred_element_type=jnp.float32)
    if not has_proj:
        # Identity shortcut: exact f32 pass-through add (re-read x_ref here so
        # the input tile does not stay live across both conv dots).
        out = out + x_ref[...].reshape(rows, wcout)

    # ---- final ReLU, lane-dense store.
    o_ref[...] = jnp.maximum(out, 0.0).reshape(bt, h, wcout)


def _banded_conv_weights(w_oihw, W):
    """(Cout, Cin, 3, 3) OIHW -> (3, W*Cin, W*Cout) block-banded per-kh matrices.

    B[kh][w'*Cin + ci, w*Cout + co] = w[co, ci, kh, w' - w + 1] when the kw tap
    w'-w+1 lies in {0,1,2}, else 0.  Band clipping at the edges implements the
    W-direction zero padding.
    """
    w_t = jnp.transpose(w_oihw, (2, 3, 1, 0)).astype(jnp.float32)   # (3,3,Cin,Cout)
    Cin, Cout = w_t.shape[2], w_t.shape[3]
    wi = jnp.arange(W)                                   # input column  w'
    wo = jnp.arange(W)                                   # output column w
    kw = wi[:, None] - wo[None, :] + 1                   # (W, W)
    valid = ((kw >= 0) & (kw <= 2)).astype(jnp.float32)
    kw_c = jnp.clip(kw, 0, 2)
    band = w_t[:, kw_c] * valid[None, :, :, None, None]  # (3, W, W, Cin, Cout)
    band = jnp.transpose(band, (0, 1, 3, 2, 4))          # (3, W, Cin, W, Cout)
    return band.reshape(3, W * Cin, W * Cout)


def _blockdiag_shortcut(ws_io, W):
    """(Cin, Cout) 1x1 weights -> (W*Cin, W*Cout) block-diagonal matrix."""
    eye = jnp.eye(W, dtype=jnp.float32)
    s = jnp.einsum('ab,io->aibo', eye, ws_io.astype(jnp.float32))
    return s.reshape(W * ws_io.shape[0], W * ws_io.shape[1])


def _round_up(v, m):
    return (v + m - 1) // m * m


def residual_block_rows(x_rows, w1, w2, ws, *, batch_tile=None):
    """Fused residual block on row-flattened NHWC activations.

    x_rows: (N, H, W*Cin) f32;  w1: (Cout, Cin, 3, 3);  w2: (Cout, Cout, 3, 3);
    ws: (Cout, Cin, 1, 1) or None (None requires Cin == Cout).
    Returns (N, H, W*Cout) f32.
    """
    N, H, WCin = x_rows.shape
    Cout, Cin = int(w1.shape[0]), int(w1.shape[1])
    assert WCin % Cin == 0
    W = WCin // Cin
    has_proj = ws is not None
    assert has_proj or Cin == Cout, "identity shortcut requires Cin == Cout"

    wcin, wcout = W * Cin, W * Cout
    # Zero-pad the lane (W*C) axis to a multiple of 128 so every operand and
    # store is full-lane; padded columns stay exactly zero end to end.
    wcin_p, wcout_p = _round_up(wcin, 128), _round_up(wcout, 128)

    if batch_tile is None:
        # >= 2 grid steps whenever N allows (both v7x TensorCores get work);
        # otherwise as many images per step as possible, up to 64 (M = bt*H
        # reaches 512-1024 on v5e/v6e, amortizing per-step overhead).
        max_bt = max(1, min(64, N // 2))
        batch_tile = next(d for d in range(max_bt, 0, -1) if N % d == 0)
    bt = batch_tile
    assert N % bt == 0

    x_pad = x_rows.astype(jnp.float32)
    if wcin_p != wcin:
        x_pad = jnp.pad(x_pad, ((0, 0), (0, 0), (0, wcin_p - wcin)))

    # Wrapper-side weight prep (would be precomputed once in a real pipeline):
    # banded conv matrices with the 3 kh taps stacked along K, cast to bf16.
    b1 = jnp.pad(_banded_conv_weights(w1, W),
                 ((0, 0), (0, wcin_p - wcin), (0, wcout_p - wcout)))
    b2 = jnp.pad(_banded_conv_weights(w2, W),
                 ((0, 0), (0, wcout_p - wcout), (0, wcout_p - wcout)))
    w1cat = b1.reshape(3 * wcin_p, wcout_p).astype(jnp.bfloat16)
    if has_proj:
        s = jnp.pad(
            _blockdiag_shortcut(jnp.transpose(ws[:, :, 0, 0], (1, 0)), W),
            ((0, wcin_p - wcin), (0, wcout_p - wcout)))
        w2cat = jnp.concatenate([b2.reshape(3 * wcout_p, wcout_p), s],
                                axis=0).astype(jnp.bfloat16)
    else:
        w2cat = b2.reshape(3 * wcout_p, wcout_p).astype(jnp.bfloat16)

    k1, k2 = 3 * wcin_p, int(w2cat.shape[0])

    # Actual MXU work of the banded formulation (not dense-conv FLOPs).
    flops = 2 * N * H * (k1 + k2) * wcout_p
    bytes_accessed = (4 * N * H * wcin_p + 2 * (k1 + k2) * wcout_p
                      + 4 * N * H * wcout_p)

    kernel = partial(_residual_block_kernel, bt=bt, h=H,
                     wcin=wcin_p, wcout=wcout_p, has_proj=has_proj)

    out_rows = pl.pallas_call(
        kernel,
        out_shape=jax.ShapeDtypeStruct((N, H, wcout_p), jnp.float32),
        grid_spec=pltpu.PrefetchScalarGridSpec(
            num_scalar_prefetch=0,
            grid=(N // bt,),
            in_specs=[
                pl.BlockSpec((bt, H, wcin_p), lambda n: (n, 0, 0)),
                pl.BlockSpec((k1, wcout_p), lambda n: (0, 0)),
                pl.BlockSpec((k2, wcout_p), lambda n: (0, 0)),
            ],
            out_specs=pl.BlockSpec((bt, H, wcout_p), lambda n: (n, 0, 0)),
            scratch_shapes=[
                pltpu.VMEM((bt, H, k1), jnp.float32),
                pltpu.VMEM((bt, H, k2), jnp.float32),
            ],
        ),
        compiler_params=pltpu.CompilerParams(
            dimension_semantics=("parallel",),
            vmem_limit_bytes=32 * 1024 * 1024,
        ),
        cost_estimate=pl.CostEstimate(flops=flops, transcendentals=0,
                                      bytes_accessed=bytes_accessed),
    )(x_pad, w1cat, w2cat)

    if wcout_p != wcout:
        out_rows = out_rows[:, :, :wcout]
    return out_rows


def residual_block(x_nchw, w1, w2, ws, *, stride=1, batch_tile=None):
    """PyTorch-compatible NCHW entry point (ResidualBlock.forward)."""
    assert stride == 1, "only stride=1 implemented in the Pallas kernel"
    N, Cin, H, W = x_nchw.shape
    Cout = int(w1.shape[0])
    # TODO(synk): carry NHWC / row-flattened activations end-to-end and call
    # residual_block_rows directly; these transposes are separate HBM round trips.
    x_rows = jnp.transpose(x_nchw, (0, 2, 3, 1)).reshape(N, H, W * Cin)
    out_rows = residual_block_rows(x_rows, w1, w2, ws, batch_tile=batch_tile)
    out = out_rows.reshape(N, H, W, Cout)
    return jnp.transpose(out, (0, 3, 1, 2))             # NHWC -> NCHW


def residual_block_ref(x, w1, w2, ws, stride=1):
    """Pure-JAX reference mirroring the PyTorch forward (NCHW)."""
    dn = ("NCHW", "OIHW", "NCHW")
    conv = partial(jax.lax.conv_general_dilated, dimension_numbers=dn,
                   precision=jax.lax.Precision.HIGHEST)
    out = conv(x, w1, (stride, stride), ((1, 1), (1, 1)))
    out = jnp.maximum(out, 0.0)
    out = conv(out, w2, (1, 1), ((1, 1), (1, 1)))
    sc = x if ws is None else conv(x, ws, (stride, stride), ((0, 0), (0, 0)))
    return jnp.maximum(out + sc, 0.0)


if __name__ == "__main__":
    key = jax.random.PRNGKey(0)
    k = jax.random.split(key, 8)

    # Case 1: projection shortcut (Cin != Cout); N=2 -> bt=1, grid=(2,).
    N, Cin, Cout, H, W = 2, 4, 8, 16, 16
    x = jax.random.normal(k[0], (N, Cin, H, W), dtype=jnp.float32)
    w1 = 0.1 * jax.random.normal(k[1], (Cout, Cin, 3, 3), dtype=jnp.float32)
    w2 = 0.1 * jax.random.normal(k[2], (Cout, Cout, 3, 3), dtype=jnp.float32)
    ws = 0.1 * jax.random.normal(k[3], (Cout, Cin, 1, 1), dtype=jnp.float32)

    out = jax.block_until_ready(residual_block(x, w1, w2, ws, stride=1))
    ref = residual_block_ref(x, w1, w2, ws, stride=1)
    assert out.shape == (N, Cout, H, W)
    # bf16 MXU operands with f32 accumulation -> compare at bf16-level tolerance.
    assert jnp.allclose(out, ref, atol=2e-2, rtol=2e-2), "mismatch (projection)"

    # Case 2: identity shortcut (Cin == Cout) — pure f32 pass-through skip path.
    C = 8
    x2 = jax.random.normal(k[4], (N, C, H, W), dtype=jnp.float32)
    w1b = 0.1 * jax.random.normal(k[5], (C, C, 3, 3), dtype=jnp.float32)
    out2 = jax.block_until_ready(residual_block(x2, w1b, w2, None, stride=1))
    ref2 = residual_block_ref(x2, w1b, w2, None, stride=1)
    assert jnp.allclose(out2, ref2, atol=2e-2, rtol=2e-2), "mismatch (identity)"

    # Case 3: larger batch (N=8 -> bt=4, grid=(2,)); exercises multi-image tiles.
    N3 = 8
    x3 = jax.random.normal(k[6], (N3, Cin, H, W), dtype=jnp.float32)
    out3 = jax.block_until_ready(residual_block(x3, w1, w2, ws, stride=1))
    ref3 = residual_block_ref(x3, w1, w2, ws, stride=1)
    assert jnp.allclose(out3, ref3, atol=2e-2, rtol=2e-2), "mismatch (batched)"

    print("KERNEL_OK")
</pallas_src>

<mosaic_0001>
module attributes {stable_mosaic.version = 11 : i64} {
  func.func @_residual_block_kernel(%arg0: i32, %arg1: memref<1x16x128xf32, #tpu.memory_space<vmem>>, %arg2: memref<384x128xbf16, #tpu.memory_space<vmem>>, %arg3: memref<512x128xbf16, #tpu.memory_space<vmem>>, %arg4: memref<1x16x128xf32, #tpu.memory_space<vmem>>, %arg5: memref<1x16x384xf32, #tpu.memory_space<vmem>>, %arg6: memref<1x16x512xf32, #tpu.memory_space<vmem>>) attributes {dimension_semantics = [#tpu.dimension_semantics<parallel>], iteration_bounds = array<i64: 2>, scalar_prefetch = 0 : i64, scratch_operands = 2 : i64, tpu.core_type = #tpu.core_type<tc>, window_params = [{transform_indices = @transform_0, window_bounds = array<i64: 1, 16, 128>}, {pipeline_mode = #tpu.pipeline_mode<synchronous>, transform_indices = @transform_1, window_bounds = array<i64: 384, 128>}, {pipeline_mode = #tpu.pipeline_mode<synchronous>, transform_indices = @transform_2, window_bounds = array<i64: 512, 128>}, {transform_indices = @transform_3, window_bounds = array<i64: 1, 16, 128>}]} {
    %cst = arith.constant 0.000000e+00 : f32
    %0 = vector.broadcast %cst : f32 to vector<1x1x128xf32>
    %cst_0 = arith.constant 0.000000e+00 : f32
    %1 = vector.broadcast %cst_0 : f32 to vector<1x1x128xf32>
    %c0 = arith.constant 0 : index
    %c0_1 = arith.constant 0 : index
    %c0_2 = arith.constant 0 : index
    %2 = vector.load %arg1[%c0, %c0_1, %c0_2] : memref<1x16x128xf32, #tpu.memory_space<vmem>>, vector<1x16x128xf32>
    %c0_3 = arith.constant 0 : index
    %c0_4 = arith.constant 0 : index
    %c128 = arith.constant 128 : index
    %3 = vector.load %arg5[%c0_3, %c0_4, %c128] : memref<1x16x384xf32, #tpu.memory_space<vmem>>, vector<1x16x128xf32>
    tpu.vector_store %arg5[%c0_3, %c0_4, %c128], %2 {strides = array<i32>} : memref<1x16x384xf32, #tpu.memory_space<vmem>>, vector<1x16x128xf32>,
    %c0_5 = arith.constant 0 : index
    %c0_6 = arith.constant 0 : index
    %c0_7 = arith.constant 0 : index
    %4 = vector.load %arg1[%c0_5, %c0_6, %c0_7] : memref<1x16x128xf32, #tpu.memory_space<vmem>>, vector<1x15x128xf32>
    %c0_8 = arith.constant 0 : index
    %c1 = arith.constant 1 : index
    %c0_9 = arith.constant 0 : index
    %5 = vector.load %arg5[%c0_8, %c1, %c0_9] : memref<1x16x384xf32, #tpu.memory_space<vmem>>, vector<1x15x128xf32>
    tpu.vector_store %arg5[%c0_8, %c1, %c0_9], %4 {strides = array<i32>} : memref<1x16x384xf32, #tpu.memory_space<vmem>>, vector<1x15x128xf32>,
    %c0_10 = arith.constant 0 : index
    %c0_11 = arith.constant 0 : index
    %c0_12 = arith.constant 0 : index
    %6 = vector.load %arg5[%c0_10, %c0_11, %c0_12] : memref<1x16x384xf32, #tpu.memory_space<vmem>>, vector<1x1x128xf32>
    tpu.vector_store %arg5[%c0_10, %c0_11, %c0_12], %0 {strides = array<i32>} : memref<1x16x384xf32, #tpu.memory_space<vmem>>, vector<1x1x128xf32>,
    %c0_13 = arith.constant 0 : index
    %c1_14 = arith.constant 1 : index
    %c0_15 = arith.constant 0 : index
    %7 = vector.load %arg1[%c0_13, %c1_14, %c0_15] : memref<1x16x128xf32, #tpu.memory_space<vmem>>, vector<1x15x128xf32>
    %c0_16 = arith.constant 0 : index
    %c0_17 = arith.constant 0 : index
    %c256 = arith.constant 256 : index
    %8 = vector.load %arg5[%c0_16, %c0_17, %c256] : memref<1x16x384xf32, #tpu.memory_space<vmem>>, vector<1x15x128xf32>
    tpu.vector_store %arg5[%c0_16, %c0_17, %c256], %7 {strides = array<i32>} : memref<1x16x384xf32, #tpu.memory_space<vmem>>, vector<1x15x128xf32>,
    %c0_18 = arith.constant 0 : index
    %c15 = arith.constant 15 : index
    %c256_19 = arith.constant 256 : index
    %9 = vector.load %arg5[%c0_18, %c15, %c256_19] : memref<1x16x384xf32, #tpu.memory_space<vmem>>, vector<1x1x128xf32>
    tpu.vector_store %arg5[%c0_18, %c15, %c256_19], %0 {strides = array<i32>} : memref<1x16x384xf32, #tpu.memory_space<vmem>>, vector<1x1x128xf32>,
    %c0_20 = arith.constant 0 : index
    %c0_21 = arith.constant 0 : index
    %c0_22 = arith.constant 0 : index
    %10 = vector.load %arg5[%c0_20, %c0_21, %c0_22] : memref<1x16x384xf32, #tpu.memory_space<vmem>>, vector<1x16x384xf32>
    %11 = vector.shape_cast %10 : vector<1x16x384xf32> to vector<16x384xf32>
    %12 = arith.truncf %11 : vector<16x384xf32> to vector<16x384xbf16>
    %c0_23 = arith.constant 0 : index
    %c0_24 = arith.constant 0 : index
    %13 = vector.load %arg2[%c0_23, %c0_24] : memref<384x128xbf16, #tpu.memory_space<vmem>>, vector<384x128xbf16>
    %cst_25 = arith.constant dense<0.000000e+00> : vector<16x128xf32>
    %14 = tpu.matmul %12, %13, %cst_25 {dimension_numbers = #tpu.dot_dimension_numbers<[1], [0], [0], [1], [0, 0, 1, 1], [], []>} : vector<16x384xbf16>, vector<384x128xbf16>, vector<16x128xf32> -> vector<16x128xf32>
    %cst_26 = arith.constant 0.000000e+00 : f32
    %15 = vector.broadcast %cst_26 : f32 to vector<16x128xf32>
    %16 = arith.maximumf %14, %15 : vector<16x128xf32>
    %17 = vector.shape_cast %16 : vector<16x128xf32> to vector<1x16x128xf32>
    %c0_27 = arith.constant 0 : index
    %c0_28 = arith.constant 0 : index
    %c128_29 = arith.constant 128 : index
    %18 = vector.load %arg6[%c0_27, %c0_28, %c128_29] : memref<1x16x512xf32, #tpu.memory_space<vmem>>, vector<1x16x128xf32>
    tpu.vector_store %arg6[%c0_27, %c0_28, %c128_29], %17 {strides = array<i32>} : memref<1x16x512xf32, #tpu.memory_space<vmem>>, vector<1x16x128xf32>,
    %c0_30 = arith.constant 0 : index
    %c0_31 = arith.constant 0 : index
    %c128_32 = arith.constant 128 : index
    %19 = vector.load %arg6[%c0_30, %c0_31, %c128_32] : memref<1x16x512xf32, #tpu.memory_space<vmem>>, vector<1x15x128xf32>
    %c0_33 = arith.constant 0 : index
    %c1_34 = arith.constant 1 : index
    %c0_35 = arith.constant 0 : index
    %20 = vector.load %arg6[%c0_33, %c1_34, %c0_35] : memref<1x16x512xf32, #tpu.memory_space<vmem>>, vector<1x15x128xf32>
    tpu.vector_store %arg6[%c0_33, %c1_34, %c0_35], %19 {strides = array<i32>} : memref<1x16x512xf32, #tpu.memory_space<vmem>>, vector<1x15x128xf32>,
    %c0_36 = arith.constant 0 : index
    %c0_37 = arith.constant 0 : index
    %c0_38 = arith.constant 0 : index
    %21 = vector.load %arg6[%c0_36, %c0_37, %c0_38] : memref<1x16x512xf32, #tpu.memory_space<vmem>>, vector<1x1x128xf32>
    tpu.vector_store %arg6[%c0_36, %c0_37, %c0_38], %1 {strides = array<i32>} : memref<1x16x512xf32, #tpu.memory_space<vmem>>, vector<1x1x128xf32>,
    %c0_39 = arith.constant 0 : index
    %c1_40 = arith.constant 1 : index
    %c128_41 = arith.constant 128 : index
    %22 = vector.load %arg6[%c0_39, %c1_40, %c128_41] : memref<1x16x512xf32, #tpu.memory_space<vmem>>, vector<1x15x128xf32>
    %c0_42 = arith.constant 0 : index
    %c0_43 = arith.constant 0 : index
    %c256_44 = arith.constant 256 : index
    %23 = vector.load %arg6[%c0_42, %c0_43, %c256_44] : memref<1x16x512xf32, #tpu.memory_space<vmem>>, vector<1x15x128xf32>
    tpu.vector_store %arg6[%c0_42, %c0_43, %c256_44], %22 {strides = array<i32>} : memref<1x16x512xf32, #tpu.memory_space<vmem>>, vector<1x15x128xf32>,
    %c0_45 = arith.constant 0 : index
    %c15_46 = arith.constant 15 : index
    %c256_47 = arith.constant 256 : index
    %24 = vector.load %arg6[%c0_45, %c15_46, %c256_47] : memref<1x16x512xf32, #tpu.memory_space<vmem>>, vector<1x1x128xf32>
    tpu.vector_store %arg6[%c0_45, %c15_46, %c256_47], %1 {strides = array<i32>} : memref<1x16x512xf32, #tpu.memory_space<vmem>>, vector<1x1x128xf32>,
    %c0_48 = arith.constant 0 : index
    %c0_49 = arith.constant 0 : index
    %c0_50 = arith.constant 0 : index
    %25 = vector.load %arg1[%c0_48, %c0_49, %c0_50] : memref<1x16x128xf32, #tpu.memory_space<vmem>>, vector<1x16x128xf32>
    %c0_51 = arith.constant 0 : index
    %c0_52 = arith.constant 0 : index
    %c384 = arith.constant 384 : index
    %26 = vector.load %arg6[%c0_51, %c0_52, %c384] : memref<1x16x512xf32, #tpu.memory_space<vmem>>, vector<1x16x128xf32>
    tpu.vector_store %arg6[%c0_51, %c0_52, %c384], %25 {strides = array<i32>} : memref<1x16x512xf32, #tpu.memory_space<vmem>>, vector<1x16x128xf32>,
    %c0_53 = arith.constant 0 : index
    %c0_54 = arith.constant 0 : index
    %c0_55 = arith.constant 0 : index
    %27 = vector.load %arg6[%c0_53, %c0_54, %c0_55] : memref<1x16x512xf32, #tpu.memory_space<vmem>>, vector<1x16x512xf32>
    %28 = vector.shape_cast %27 : vector<1x16x512xf32> to vector<16x512xf32>
    %29 = arith.truncf %28 : vector<16x512xf32> to vector<16x512xbf16>
    %c0_56 = arith.constant 0 : index
    %c0_57 = arith.constant 0 : index
    %30 = vector.load %arg3[%c0_56, %c0_57] : memref<512x128xbf16, #tpu.memory_space<vmem>>, vector<512x128xbf16>
    %cst_58 = arith.constant dense<0.000000e+00> : vector<16x128xf32>
    %31 = tpu.matmul %29, %30, %cst_58 {dimension_numbers = #tpu.dot_dimension_numbers<[1], [0], [0], [1], [0, 0, 1, 1], [], []>} : vector<16x512xbf16>, vector<512x128xbf16>, vector<16x128xf32> -> vector<16x128xf32>
    %cst_59 = arith.constant 0.000000e+00 : f32
    %32 = vector.broadcast %cst_59 : f32 to vector<16x128xf32>
    %33 = arith.maximumf %31, %32 : vector<16x128xf32>
    %34 = vector.shape_cast %33 : vector<16x128xf32> to vector<1x16x128xf32>
    %c0_60 = arith.constant 0 : index
    %c0_61 = arith.constant 0 : index
    %c0_62 = arith.constant 0 : index
    %35 = vector.load %arg4[%c0_60, %c0_61, %c0_62] : memref<1x16x128xf32, #tpu.memory_space<vmem>>, vector<1x16x128xf32>
    tpu.vector_store %arg4[%c0_60, %c0_61, %c0_62], %34 {strides = array<i32>} : memref<1x16x128xf32, #tpu.memory_space<vmem>>, vector<1x16x128xf32>,
    return
  }
  func.func @transform_0(%arg0: i32) -> (i32, i32, i32) {
    %c0_i32 = arith.constant 0 : i32
    %c0_i32_0 = arith.constant 0 : i32
    %c0_i32_1 = arith.constant 0 : i32
    return %arg0, %c0_i32, %c0_i32_0 : i32, i32, i32
  }
  func.func @transform_1(%arg0: i32) -> (i32, i32) {
    %c0_i32 = arith.constant 0 : i32
    %c0_i32_0 = arith.constant 0 : i32
    %c0_i32_1 = arith.constant 0 : i32
    return %c0_i32, %c0_i32_0 : i32, i32
  }
  func.func @transform_2(%arg0: i32) -> (i32, i32) {
    %c0_i32 = arith.constant 0 : i32
    %c0_i32_0 = arith.constant 0 : i32
    %c0_i32_1 = arith.constant 0 : i32
    return %c0_i32, %c0_i32_0 : i32, i32
  }
  func.func @transform_3(%arg0: i32) -> (i32, i32, i32) {
    %c0_i32 = arith.constant 0 : i32
    %c0_i32_0 = arith.constant 0 : i32
    %c0_i32_1 = arith.constant 0 : i32
    return %arg0, %c0_i32, %c0_i32_0 : i32, i32, i32
  }
}

</mosaic_0001>

<bundles_post_ra>
// kernel: tpu_custom_call.1
= control target key start
LH: loop header
LB: loop body
LE: loop exit
PB: predicated region body
PF: predicated region fallthrough
CT: control target
= control target key end

     0   :  { %8 = vsyncpa [#allocation5], 0  ;;  %s1681_s0 = inlined_call_operand.hbm [shape: f32[2,16,128], index: 0, kind: input, shape index: {}]   ;;  %s1682_s1 = inlined_call_operand.hbm [shape: bf16[384,128], index: 1, kind: input, shape index: {}]   ;;  %s1683_s2 = inlined_call_operand.hbm [shape: bf16[512,128], index: 2, kind: input, shape index: {}]   ;;  %s1684_s3 = inlined_call_operand.hbm [shape: f32[2,16,128], index: 3, kind: output, shape index: {}]  }
   0x1   :  { %10 = vsyncpa [#allocation5 + $0x1], 0 }
   0x2   :  { %11 = vsyncpa [#allocation8], 0 }
   0x3   :  { %12 = vsyncpa [#allocation6], 0 }
   0x4   :  { %14 = vsyncpa [#allocation6 + $0x1], 0  ;;  %s1523_s12 = smov 0   ;;  %s1525_s13 = smov 0  }
   0x5   :  { %s1527_s14 = smov 0   ;;  %s1529_s15 = smov 0  }
   0x6 LB: > { %s1544_s16 = sadd.s32 4294967295, %s1492_s15   ;;  %s958_s17 = sadd.s32 4294967294, %s1492_s15   ;;  %s1492_s15 = sphi %s1529_s15, %s1694_s15   ;;  %s1488_s14 = sphi %s1527_s14, %s1693_s14   ;;  %s1484_s13 = sphi %s1525_s13, %s1692_s13   ;;  %s1480_s12 = sphi %s1523_s12, %s1691_s12  }
   0x7   : > { %p40_p0 = scmp.ne.s32.totalorder %s1484_s13, %s1480_s12  ;;  %p41_p1 = scmp.eq.s32.totalorder %s1544_s16, 0 }
   0x8   : > { %p106_p2 = scmp.eq.s32.totalorder %s1544_s16, 1  ;;  %p112_p3 = scmp.eq.s32.totalorder %s958_s17, 1 }
   0x9   : > { %p1553_p4 = por %p41_p1, %p40_p0  ;;  %p959_p5 = scmp.ge.s32.totalorder %s1492_s15, 1 }
   0xa   : > { %p1558_p6 = por %p112_p3, %p40_p0  ;;  %p119_p7 = scmp.lt.s32.totalorder %s1492_s15, 3 }
   0xb   : > { %s130_s22 = sshll.u32 %s1682_s1, 4  ;;  %s1494_s24 = smov [#allocation7]   ;;  %s131_s22 = int_to_ptr.hbm [resolvable:$true] %s130_s22 }
   0xc   : > { %p1566_p8 = pnand %p959_p5, %p119_p7  ;;  %s132_s25 = sshll.u32 %s1494_s24, 4  ;;  %s133_s25 = int_to_ptr.vmem [resolvable:$true] %s132_s25 }
   0xd   : > { %s144_s28 = sshll.u32 %s1683_s2, 4  ;;  %s1495_s29 = smov 64   ;;  %s145_s28 = int_to_ptr.hbm [resolvable:$true] %s144_s28 }
   0xe   : > { %p1270_p9 = pneg %p1566_p8  ;;  %s1496_s30 = smov 4  }
   0xf   : > { %s1497_s4 = smov [#allocation9]   ;;  %s1579_s6 = sadd.s32 1, %s1492_s15  }
  0x10   : > { %p1271_p10 = pnand %p1270_p9, %p41_p1  ;;  %s146_s5 = sshll.u32 %s1497_s4, 4  ;;  %s147_s5 = int_to_ptr.vmem [resolvable:$true] %s146_s5 }
  0x11   : > { %s27_s7 = sadd.s32 1, %s1488_s14  ;;  %s24_s8 = ssub.s32 %s1492_s15, %s1579_s6 }
  0x12   : > { %1273 = dma.hbm_to_vmem [thread:$0]  (!%p1271_p10), %s131_s22, 3072, %s133_s25, [#allocation8], %s1495_s29, %s1495_s29, %s1496_s30  }
  0x13   : > { %1276 = dma.hbm_to_vmem [thread:$0]  (!%p1271_p10), %s145_s28, 4096, %s147_s5, [#allocation8], %s1495_s29, %s1495_s29, %s1496_s30  }
  0x14   : > { %p34_p12 = scmp.ne.s32.totalorder %s1488_s14, %s1484_s13  ;;  %p25_p13 = scmp.eq.s32.totalorder %s24_s8, 0 }
  0x15   : > { %p35_p0 = scmp.eq.s32.totalorder %s1492_s15, 0  ;;  %p1287_p5 = scmp.lt.s32.totalorder %s1492_s15, 2 }
  0x16   : > { %p1589_p3 = por %p106_p2, %p34_p12  ;;  %s160_s11 = sand.u32 1, %s1488_s14  }
  0x17   : > { %s1595_s10 = scalar_select %p25_p13, %s1488_s14, %s27_s7  }
  0x18   : > { %p36_p7 = por %p35_p0, %p34_p12  ;;  %s963_s17 = sshll.u32 %s160_s11, 4 }
  0x19   : > { %s1200_s20 = sshll.u32 %s1492_s15, 4  ;;  %s164_s25 = scalar_lea.vmem [#allocation4], %s963_s17 }
  0x1a   : > { %s169_s24 = scalar_lea.hbm %s1681_s0, %s1200_s20  ;;  %s172_s26 = sshll.u32 %s164_s25, 4  ;;  %s173_s26 = int_to_ptr.vmem [resolvable:$true] %s172_s26 }
  0x1b   : > { %s170_s27 = sshll.u32 %s169_s24, 4  ;;  %p1602_p2 = pnand %p1287_p5, %p36_p7  ;;  %s171_s27 = int_to_ptr.hbm [resolvable:$true] %s170_s27 }
  0x1c   : > { %s161_s29 = scalar_lea.sflag [#allocation5], %s160_s11  ;;  %s1392_s30 = sshra.s32 %s171_s27, 4  ;;  %s1393_s30 = int_to_ptr.hbm [resolvable:$true] %s1392_s30 }
  0x1d   : > { %s1394_s4 = scalar_lea.hbm %s1393_s30, 16  ;;  %p1396_p10 = pneg %p1602_p2 }
  0x1e   : > { %p1395_p9 = scmp.ne.s32.totalorder %s1393_s30, %s1394_s4  ;;  %s1399_s8 = scalar_lea.hbm %s1681_s0, 32 }
  0x1f   : > { %p1400_p0 = scmp.lt.s32.totalorder %s1393_s30, %s1681_s0  ;;  %p1401_p5 = scmp.lt.s32.totalorder %s1399_s8, %s1394_s4 }
  0x20   : > { %p1397_p12 = pnand %p1396_p10, %p1395_p9 }
  0x21   : > { %p1402_p7 = por %p1401_p5, %p1400_p0 }
  0x22   : > { %p1398_p13 = pneg %p1397_p12 }
  0x24   : > { %p1403_p11 = pnand %p1402_p7, %p1398_p13 }
  0x26   : > { %1406 = shalt.err (!%p1403_p11)
}
  0x27   : > { %s1498_s11 = smov 128   ;;  %s1499_s21 = smov 8  }
  0x28   : > { %1280 = dma.hbm_to_vmem [thread:$0]  (!%p1602_p2), %s171_s27, 256, %s173_s26, %s161_s29, %s1498_s11, %s1498_s11, %s1499_s21  }
  0x29   : > { %184 = sbr.rel (%p1566_p8) target bundleno = 392 (0x188), region = 32  ;;  %s1619_s22 = sand.u32 (!%p1566_p8), 1, %s1484_s13  }
  0x2a   : > { %s967_s24 = sshll.u32 (!%p1566_p8), %s1619_s22, 4  ;;  %s187_s25 = scalar_lea.sflag (!%p1566_p8), [#allocation5], %s1619_s22 }
  0x2b   : > { %s1625_s30 = scalar_lea.vmem (!%p1566_p8), [#allocation4], %s967_s24 }
  0x2e   : > { %1467 = dma.done.wait (%p1553_p4), %s187_s25, 256  }
  0x2f   : > { %1469 = vsyncadd (%p1553_p4), %s187_s25, 4294967040 }
  0x30   : > { %1471 = dma.done.wait (%p41_p1), [#allocation8], 7168  }
  0x31   : > { %1473 = vsyncadd (%p41_p1), [#allocation8], 4294960128  ;;  %v1500_v0 = vmov 0.0   ;;  %v1208_v1 = vld [vmem:[#allocation7 + $0x38] sm:$0xff]  ;;  %v1207_v4 = vld [vmem:[#allocation7 + $0x30] sm:$0xff]  ;;  %vm232_vm0 = vcmask 1040384  }
  0x32   : > { %240 = vst [vmem:[#allocation2] sm:$0x1] %v1500_v0  ;;  %v1216_v2 = vld [vmem:[#allocation7 + $0x78] sm:$0xff]  ;;  %447 = vmatpush.bf16.msra.mxu0 %v1208_v1  ;;  %v1215_v5 = vld [vmem:[#allocation7 + $0x70] sm:$0xff]  ;;  %v1206_v7 = vld [vmem:[#allocation7 + $0x28] sm:$0xff]  ;;  %vm509_vm1 = vcmask 1046528  }
  0x33   : > { %245 = vst [vmem:[#allocation2 + $0x2f] sm:$0x1] %v1500_v0  ;;  %v1224_v3 = vld [vmem:[#allocation7 + $0xb8] sm:$0xff]  ;;  %461 = vmatpush.bf16.msra.mxu1 %v1216_v2  ;;  %v1223_v6 = vld [vmem:[#allocation7 + $0xb0] sm:$0xff]  ;;  %v1214_v8 = vld [vmem:[#allocation7 + $0x68] sm:$0xff]  ;;  %s1257_s18 = sshll.u32 %s1544_s16, 4 }
  0x34   : > { %504 = vst [vmem:[#allocation3] sm:$0x1] %v1500_v0  ;;  %475 = vmatpush.bf16.msra.mxu2 %v1224_v3  ;;  %v1222_v9 = vld [vmem:[#allocation7 + $0xa8] sm:$0xff]  ;;  %v228_v10 = vld [vmem:[%s1625_s30] sm:$0xff]  ;;  %v1204_v21 = vld [vmem:[#allocation7 + $0x18] sm:$0xff]  ;;  %s862_s27 = scalar_lea.hbm %s1684_s3, %s1257_s18  ;;  %s223_s28 = scalar_lea.vmem [#allocation10], %s967_s24 }
  0x35   : > { %517 = vst [vmem:[#allocation3 + $0x37] sm:$0x1] %v1500_v0  ;;  %v229_v11 = vld [vmem:[%s1625_s30 + $0x8] sm:$0x7f]  ;;  %v233_v12 = vrot.slane %v228_v10, 7  ;;  %v1205_v15 = vld [vmem:[#allocation7 + $0x20] sm:$0xff] }
  0x36   : > { %448 = vmatpush.bf16.msra.mxu0 %v1207_v4  ;;  %v234_v13 = vrot.slane %v229_v11, 7  ;;  %v225_v14 = vld [vmem:[%s1625_s30 + $0x8] sm:$0xff]  ;;  %v1213_v16 = vld [vmem:[#allocation7 + $0x60] sm:$0xff]  ;;  %v1203_v24 = vld [vmem:[#allocation7 + $0x10] sm:$0xff]  ;;  %s863_s29 = sshll.u32 %s223_s28, 4  ;;  %s865_s4 = sshll.u32 %s862_s27, 4  ;;  %s864_s29 = int_to_ptr.vmem [resolvable:$true] %s863_s29  ;;  %s866_s4 = int_to_ptr.hbm [resolvable:$true] %s865_s4 }
  0x37   : > { %462 = vmatpush.bf16.msra.mxu1 %v1215_v5  ;;  %v1221_v17 = vld [vmem:[#allocation7 + $0xa0] sm:$0xff]  ;;  %238 = vst [vmem:[#allocation2] sm:$0xfe] %v233_v12  ;;  %v242_v19 = vld [vmem:[%s1625_s30 + $0x9] sm:$0x7f]  ;;  %v1211_v25 = vld [vmem:[#allocation7 + $0x50] sm:$0xff]  ;;  %v1641_v37 = vpack.c.bf16 %v225_v14, %v228_v10 }
  0x38   : > { %476 = vmatpush.bf16.msra.mxu2 %v1223_v6  ;;  %v235_v18 = vsel %vm232_vm0, %v233_v12, %v234_v13  ;;  %v241_v20 = vld [vmem:[%s1625_s30 + $0x1] sm:$0xff]  ;;  %244 = vst [vmem:[#allocation2 + $0x28] sm:$0x7f] %v242_v19  ;;  %s851_s16 = scalar_lea.sflag [#allocation6], %s1619_s22  ;;  %s1436_s5 = sshra.s32 %s866_s4, 4  ;;  %s1437_s5 = int_to_ptr.hbm [resolvable:$true] %s1436_s5 }
  0x39   : > { %v1212_v22 = vld [vmem:[#allocation7 + $0x58] sm:$0xff]  ;;  %v1219_v26 = vld [vmem:[#allocation7 + $0x90] sm:$0xff]  ;;  %v1202_v27 = vld [vmem:[#allocation7 + $0x8] sm:$0xff]  ;;  %s1438_s7 = scalar_lea.hbm %s1437_s5, 16  ;;  %s1442_s20 = scalar_lea.hbm %s1684_s3, 32 }
  0x3a   : > { %449 = vmatpush.bf16.msra.mxu0 %v1206_v7  ;;  %v1220_v23 = vld [vmem:[#allocation7 + $0x98] sm:$0xff]  ;;  %v1210_v28 = vld [vmem:[#allocation7 + $0x48] sm:$0xff]  ;;  %v1201_v30 = vld [vmem:[#allocation7] sm:$0xff]  ;;  %p1439_p1 = scmp.ne.s32.totalorder %s1437_s5, %s1438_s7  ;;  %p1443_p11 = scmp.lt.s32.totalorder %s1437_s5, %s1684_s3 }
  0x3b   : > { %463 = vmatpush.bf16.msra.mxu1 %v1214_v8  ;;  %v1218_v29 = vld [vmem:[#allocation7 + $0x88] sm:$0xff]  ;;  %v1209_v31 = vld [vmem:[#allocation7 + $0x40] sm:$0xff]  ;;  %v1240_v35 = vld [vmem:[#allocation9 + $0x78] sm:$0xff]  ;;  %p1444_p2 = scmp.lt.s32.totalorder %s1442_s20, %s1438_s7 }
  0x3c   : > { %477 = vmatpush.bf16.msra.mxu2 %v1222_v9  ;;  %v1217_v33 = vld [vmem:[#allocation7 + $0x80] sm:$0xff]  ;;  %v1239_v39 = vld [vmem:[#allocation9 + $0x70] sm:$0xff]  ;;  %v1256_v40 = vld [vmem:[#allocation9 + $0xf8] sm:$0xff]  ;;  %p1440_p4 = pnand %p1439_p1, %p1589_p3 }
  0x3d   : > { %v1238_v41 = vld [vmem:[#allocation9 + $0x68] sm:$0xff]  ;;  %v1248_v42 = vld [vmem:[#allocation9 + $0xb8] sm:$0xff]  ;;  %v1255_v44 = vld [vmem:[#allocation9 + $0xf0] sm:$0xff]  ;;  %p1445_p9 = por %p1444_p2, %p1443_p11 }
  0x3e   : > { %450 = vmatpush.bf16.msra.mxu0 %v1205_v15  ;;  %v246_v32 = vld [vmem:[#allocation2] sm:$0xff]  ;;  %v1232_v43 = vld [vmem:[#allocation9 + $0x38] sm:$0xff]  ;;  %v1237_v45 = vld [vmem:[#allocation9 + $0x60] sm:$0xff]  ;;  %p1441_p8 = pneg %p1440_p4 }
  0x3f   : > { %464 = vmatpush.bf16.msra.mxu1 %v1213_v16  ;;  %v251_v34 = vld [vmem:[#allocation2 + $0x28] sm:$0xff]  ;;  %v252_v36 = vpack.c.bf16 %v235_v18, %v246_v32  ;;  %790 = vmatpush.bf16.msra.mxu3 %v1232_v43  ;;  %v1247_v46 = vld [vmem:[#allocation9 + $0xb0] sm:$0xff]  ;;  %v1254_v48 = vld [vmem:[#allocation9 + $0xe8] sm:$0xff] }
  0x40   : > { %478 = vmatpush.bf16.msra.mxu2 %v1221_v17  ;;  %v254_v38 = vpack.c.bf16 %v251_v34, %v241_v20  ;;  %v1231_v47 = vld [vmem:[#allocation9 + $0x30] sm:$0xff]  ;;  %v1236_v49 = vld [vmem:[#allocation9 + $0x58] sm:$0xff]  ;;  %v1246_v50 = vld [vmem:[#allocation9 + $0xa8] sm:$0xff]  ;;  %p1446_p10 = pnand %p1445_p9, %p1441_p8 }
  0x41   : > { %v1230_v51 = vld [vmem:[#allocation9 + $0x28] sm:$0xff]  ;;  %v1253_v52 = vld [vmem:[#allocation9 + $0xe0] sm:$0xff]  ;;  %v1235_v53 = vld [vmem:[#allocation9 + $0x50] sm:$0xff] }
  0x42   : > { %451 = vmatpush.bf16.msra.mxu0 %v1204_v21  ;;  %v1245_v54 = vld [vmem:[#allocation9 + $0xa0] sm:$0xff]  ;;  %v1252_v56 = vld [vmem:[#allocation9 + $0xd8] sm:$0xff]  ;;  %v1234_v57 = vld [vmem:[#allocation9 + $0x48] sm:$0xff] }
  0x43   : > { %465 = vmatpush.bf16.msra.mxu1 %v1212_v22  ;;  %791 = vmatpush.bf16.msra.mxu3 %v1231_v47  ;;  %v1229_v55 = vld [vmem:[#allocation9 + $0x20] sm:$0xff]  ;;  %v1244_v58 = vld [vmem:[#allocation9 + $0x98] sm:$0xff]  ;;  %v1251_v60 = vld [vmem:[#allocation9 + $0xd0] sm:$0xff] }
  0x44   : > { %479 = vmatpush.bf16.msra.mxu2 %v1220_v23  ;;  %v1228_v59 = vld [vmem:[#allocation9 + $0x18] sm:$0xff]  ;;  %v1233_v61 = vld [vmem:[#allocation9 + $0x40] sm:$0xff]  ;;  %v1243_v62 = vld [vmem:[#allocation9 + $0x90] sm:$0xff] }
  0x45   : > { %v1227_v63 = vld [vmem:[#allocation9 + $0x10] sm:$0xff]  ;;  %v1250_v0 = vld [vmem:[#allocation9 + $0xc8] sm:$0xff]  ;;  %v1249_v3 = vld [vmem:[#allocation9 + $0xc0] sm:$0xff] }
  0x46   : > { %452 = vmatpush.bf16.msra.mxu0 %v1203_v24  ;;  %v1242_v1 = vld [vmem:[#allocation9 + $0x88] sm:$0xff]  ;;  %v1241_v4 = vld [vmem:[#allocation9 + $0x80] sm:$0xff] }
  0x47   : > { %466 = vmatpush.bf16.msra.mxu1 %v1211_v25  ;;  %792 = vmatpush.bf16.msra.mxu3 %v1230_v51  ;;  %v1226_v2 = vld [vmem:[#allocation9 + $0x8] sm:$0xff]  ;;  %v1225_v5 = vld [vmem:[#allocation9] sm:$0xff] }
  0x48   : > { %480 = vmatpush.bf16.msra.mxu2 %v1219_v26 }
  0x4a   : > { %453 = vmatpush.bf16.msra.mxu0 %v1202_v27 }
  0x4b   : > { %467 = vmatpush.bf16.msra.mxu1 %v1210_v28  ;;  %793 = vmatpush.bf16.msra.mxu3 %v1229_v55 }
  0x4c   : > { %481 = vmatpush.bf16.msra.mxu2 %v1218_v29 }
  0x4e   : > { %454 = vmatpush.bf16.msra.mxu0 %v1201_v30 }
  0x4f   : > { %468 = vmatpush.bf16.msra.mxu1 %v1209_v31  ;;  %794 = vmatpush.bf16.msra.mxu3 %v1228_v59 }
  0x50   : > { %482 = vmatpush.bf16.msra.mxu2 %v1217_v33 }
  0x51   : > { %455 = vmatmul.bf16.vlgmr.msra.gmra.mxu0 %v252_v36 }
  0x52   : > { %804 = vmatpush.bf16.msrb.mxu0 %v1240_v35  ;;  %469 = vmatmul.bf16.vlgmr.msra.gmra.mxu1 %v1641_v37 }
  0x53   : > { %483 = vmatmul.bf16.vlgmr.msra.gmra.mxu2 %v254_v38  ;;  %818 = vmatpush.bf16.msrb.mxu1 %v1248_v42 }
  0x54   : > { %832 = vmatpush.bf16.msrb.mxu2 %v1256_v40  ;;  %795 = vmatpush.bf16.msra.mxu3 %v1227_v63 }
  0x56   : > { %805 = vmatpush.bf16.msrb.mxu0 %v1239_v39 }
  0x57   : > { %819 = vmatpush.bf16.msrb.mxu1 %v1247_v46 }
  0x58   : > { %833 = vmatpush.bf16.msrb.mxu2 %v1255_v44  ;;  %796 = vmatpush.bf16.msra.mxu3 %v1226_v2 }
  0x5a   : > { %806 = vmatpush.bf16.msrb.mxu0 %v1238_v41 }
  0x5b   : > { %820 = vmatpush.bf16.msrb.mxu1 %v1246_v50 }
  0x5c   : > { %834 = vmatpush.bf16.msrb.mxu2 %v1254_v48  ;;  %797 = vmatpush.bf16.msra.mxu3 %v1225_v5 }
  0x5e   : > { %807 = vmatpush.bf16.msrb.mxu0 %v1237_v45 }
  0x5f   : > { %821 = vmatpush.bf16.msrb.mxu1 %v1245_v54 }
  0x60   : > { %835 = vmatpush.bf16.msrb.mxu2 %v1253_v52 }
  0x62   : > { %808 = vmatpush.bf16.msrb.mxu0 %v1236_v49 }
  0x63   : > { %822 = vmatpush.bf16.msrb.mxu1 %v1244_v58 }
  0x64   : > { %836 = vmatpush.bf16.msrb.mxu2 %v1252_v56 }
  0x66   : > { %809 = vmatpush.bf16.msrb.mxu0 %v1235_v53 }
  0x67   : > { %823 = vmatpush.bf16.msrb.mxu1 %v1243_v62 }
  0x68   : > { %837 = vmatpush.bf16.msrb.mxu2 %v1251_v60 }
  0x6a   : > { %810 = vmatpush.bf16.msrb.mxu0 %v1234_v57 }
  0x6b   : > { %824 = vmatpush.bf16.msrb.mxu1 %v1242_v1 }
  0x6c   : > { %838 = vmatpush.bf16.msrb.mxu2 %v1250_v0 }
  0x6e   : > { %811 = vmatpush.bf16.msrb.mxu0 %v1233_v61 }
  0x6f   : > { %825 = vmatpush.bf16.msrb.mxu1 %v1241_v4 }
  0x70   : > { %839 = vmatpush.bf16.msrb.mxu2 %v1249_v3 }
  0x73   : > { %840 = vmatmul.bf16.vlgmr.msrb.gmra.mxu2 %v1641_v37 }
  0xce   : > { %v456_v6 = vpop.f32.mrf.mxu0 }
  0xcf   : > { %v470_v7 = vpop.f32.mrf.mxu1 }
  0xd0   : > { %v471_v8 = vadd.f32 %v470_v7, %v456_v6 }
  0xd6   : > { %v484_v9 = vpop.f32.mrf.mxu2  ;;  %v458_v12 = vpop.f32.mrf.mxu0 }
  0xd7   : > { %v485_v10 = vadd.f32 %v484_v9, %v471_v8  ;;  %v472_v13 = vpop.f32.mrf.mxu1 }
  0xd8   : > { %v473_v15 = vadd.f32 %v472_v13, %v458_v12 }
  0xd9   : > { %v489_v11 = vmax.f32 %v485_v10, 0.0 }
  0xdb   : > { %491 = vst [vmem:[#allocation3 + $0x8] sm:$0xff] %v489_v11  ;;  %v497_v14 = vrot.slane %v489_v11, 7 }
  0xdd   : > { %502 = vst [vmem:[#allocation3] sm:$0xfe] %v497_v14 }
  0xde   : > { %v486_v16 = vpop.f32.mrf.mxu2 }
  0xdf   : > { %v487_v17 = vadd.f32 %v486_v16, %v473_v15 }
  0xe1   : > { %v490_v18 = vmax.f32 %v487_v17, 0.0 }
  0xe2   : > { %v505_v19 = vld [vmem:[#allocation3 + $0x8] sm:$0xfe] }
  0xe3   : > { %v510_v20 = vrot.slane %v505_v19, 1  ;;  %492 = vst [vmem:[#allocation3 + $0x28] sm:$0xff] %v490_v18  ;;  %v511_v21 = vrot.slane %v490_v18, 1  ;;  %v531_v22 = vpack.c.bf16 %v490_v18, %v489_v11 }
  0xe4   : > { %v522_v28 = vld [vmem:[#allocation3] sm:$0xff] }
  0xe5   : > { %516 = vst [vmem:[#allocation3 + $0x30] sm:$0x7f] %v511_v21  ;;  %812 = vmatmul.bf16.vlgmr.msrb.gmra.mxu0 %v531_v22  ;;  %v512_v23 = vsel %vm509_vm1, %v510_v20, %v511_v21 }
  0xea   : > { %v494_v24 = vld [vmem:[#allocation3 + $0x28] sm:$0x7f] }
  0xeb   : > { %v498_v25 = vrot.slane %v494_v24, 7 }
  0xec   : > { %v528_v26 = vld [vmem:[#allocation3 + $0x30] sm:$0xff] }
  0xed   : > { %v499_v27 = vsel %vm232_vm0, %v497_v14, %v498_v25  ;;  %v532_v29 = vpack.c.bf16 %v528_v26, %v512_v23 }
  0xee   : > { %v530_v30 = vpack.c.bf16 %v499_v27, %v522_v28 }
  0xef   : > { %826 = vmatmul.bf16.vlgmr.msrb.gmra.mxu1 %v532_v29 }
  0xf0   : > { %798 = vmatmul.bf16.vlgmr.msra.gmra.mxu3 %v530_v30 }
  0xf6   : > { %v841_v35 = vpop.f32.mrf.mxu2 }
  0xfe   : > { %v843_v44 = vpop.f32.mrf.mxu2 }
 0x162   : > { %v813_v31 = vpop.f32.mrf.mxu0 }
 0x16a   : > { %v815_v39 = vpop.f32.mrf.mxu0 }
 0x16c   : > { %v827_v32 = vpop.f32.mrf.mxu1 }
 0x173   : > { %v799_v33 = vpop.f32.mrf.mxu3 }
 0x174   : > { %v814_v34 = vadd.f32 %v813_v31, %v799_v33  ;;  %v829_v42 = vpop.f32.mrf.mxu1 }
 0x176   : > { %v828_v36 = vadd.f32 %v827_v32, %v814_v34 }
 0x178   : > { %v842_v37 = vadd.f32 %v841_v35, %v828_v36 }
 0x17a   : > { %v846_v38 = vmax.f32 %v842_v37, 0.0 }
 0x17b   : > { %v801_v40 = vpop.f32.mrf.mxu3 }
 0x17c   : > { %848 = vst [vmem:[%s223_s28] sm:$0xff] %v846_v38  ;;  %v816_v41 = vadd.f32 %v815_v39, %v801_v40 }
 0x17e   : > { %v830_v43 = vadd.f32 %v829_v42, %v816_v41 }
 0x180   : > { %v844_v45 = vadd.f32 %v843_v44, %v830_v43 }
 0x182   : > { %v847_v46 = vmax.f32 %v844_v45, 0.0 }
 0x184   : > { %849 = vst [vmem:[%s223_s28 + $0x8] sm:$0xff] %v847_v46 }
 0x185   : > { %1449 = shalt.err (!%p1446_p10)
}
 0x186   : > { %s1501_s22 = smov 128   ;;  %s1502_s24 = smov 8  }
 0x187   : > { %1268 = dma.vmem_to_hbm [thread:$0]  (%p1589_p3), %s864_s29, 256, %s866_s4, %s851_s16, %s1501_s22, %s1501_s22, %s1502_s24  }
 0x188 PF: > { %s880_s25 = sand.u32 1, %s1480_s12   ;;  %p1690_p12 = scmp.ge.s32.totalorder %s1492_s15, 2 }
 0x189   : > { %s881_s30 = scalar_lea.sflag [#allocation6], %s880_s25 }
 0x18a   : > { %p1282_p13 = pnand %p1690_p12, %p1558_p6 }
 0x18c   : > { %p1283_p0 = pneg %p1282_p13 }
 0x18e   : > { %1475 = dma.done.wait (%p1283_p0), %s881_s30, 256  }
 0x18f   : > { %1477 = vsyncadd (%p1283_p0), %s881_s30, 4294967040  ;;  %p17_p5 = scmp.ge.s32.totalorder %s1579_s6, 4   ;;  %s1691_s12 = smov %s1484_s13 }
 0x190   : > { %s1692_s13 = smov %s1488_s14  ;;  %s1693_s14 = smov %s1595_s10 }
 0x191   : > { %s1694_s15 = smov %s1579_s6  ;;  %19 = sbr.rel (!%p17_p5) target bundleno = 6 (0x6), region = 85 }
 0x196   :  { %887 = vsyncpa [#allocation5], 1 }
 0x197   :  { %889 = vsyncpa [#allocation5 + $0x1], 1 }
 0x198   :  { %890 = vsyncpa [#allocation8], 1 }
 0x199   :  { %891 = vsyncpa [#allocation6], 1 }
 0x19a   :  { %893 = vsyncpa [#allocation6 + $0x1], 1 }

</bundles_post_ra>
